<compile_context>
chip_gen: v5e
topology: v5e:2x2
jax: 0.10.0
libtpu: 0.0.40
codegen_flags: <defaults>
</compile_context>

<pallas_src>
import functools

import jax
import jax.numpy as jnp
from jax import lax
from jax.experimental import pallas as pl
from jax.experimental.pallas import tpu as pltpu


def _fedalign_tile_kernel(logits_ref, targets_ref, weights_ref, out_ref, *, n_total):
    """One row-tile of weighted cross-entropy; writes this tile's partial loss sum.

    logits_ref : (TILE_N, C)  native dtype (f32 / bf16), cast to f32 in-kernel
    targets_ref: (TILE_N, 1)  int32
    weights_ref: (1, C)       f32  (same block every grid step)
    out_ref    : (8, 128)     f32  lane-dense per-tile partial-sum slab
    """
    pid = pl.program_id(0)
    tile_n = logits_ref.shape[0]

    logits = logits_ref[...].astype(jnp.float32)                 # (T, C)
    tgt = targets_ref[...]                                        # (T, 1) int32
    w = weights_ref[...].astype(jnp.float32)                      # (1, C)

    # numerically-stable log-softmax along the class (lane) axis
    m = jnp.max(logits, axis=-1, keepdims=True)                   # (T, 1)
    shifted = logits - m                                           # (T, C)
    lse = jnp.log(jnp.sum(jnp.exp(shifted), axis=-1, keepdims=True))
    logp = shifted - lse                                           # (T, C)

    # fused one-hot gather: put w[y_i] in the target lane, single cross-lane reduction
    col = lax.broadcasted_iota(jnp.int32, logits.shape, 1)         # (T, C)
    sel = jnp.where(col == tgt, w, 0.0)                            # (T, C): w[y_i] at lane y_i
    per_sample = -jnp.sum(sel * logp, axis=-1, keepdims=True)      # (T, 1) = -w[y_i]*log p_{y_i}

    # mask tail rows of the last (ragged) tile; also kills NaN/Inf from padded garbage rows
    row = lax.broadcasted_iota(jnp.int32, (tile_n, 1), 0)
    valid = (pid * tile_n + row) < n_total
    per_sample = jnp.where(valid, per_sample, 0.0)

    tile_sum = jnp.sum(per_sample, keepdims=True)                  # (1, 1)
    out_ref[...] = jnp.broadcast_to(tile_sum, out_ref.shape)       # lane-dense store


def _choose_tile_n(n, c, itemsize):
    """Largest row tile that keeps a double-buffered logits tile ~4 MiB (safe on v5e/v6e/v7x)."""
    target_bytes = 4 * 1024 * 1024
    rows = max(8, target_bytes // max(1, c * itemsize))
    if rows >= n:
        return n                          # single full-extent block
    return max(8, (rows // 8) * 8)        # keep the sublane dim a multiple of 8


def _fedalign_loss_call(logits, targets, weights, *, tile_n=None):
    """logits: (N, C), targets: (N,), weights: (C,) -> scalar f32 = mean_i(-w[y_i]*log p_i[y_i])."""
    n, c = logits.shape
    targets_2d = targets.reshape(n, 1).astype(jnp.int32)
    weights_2d = weights.reshape(1, c).astype(jnp.float32)

    itemsize = jnp.dtype(logits.dtype).itemsize
    if tile_n is None:
        tile_n = _choose_tile_n(n, c, itemsize)
    tile_n = min(tile_n, n)
    if tile_n < n:
        tile_n = max(8, (tile_n // 8) * 8)
    num_tiles = pl.cdiv(n, tile_n)

    kernel = functools.partial(_fedalign_tile_kernel, n_total=n)

    cost = pl.CostEstimate(
        flops=8 * n * c,
        transcendentals=n * c,
        bytes_accessed=n * c * itemsize + n * 4 + c * 4 + num_tiles * 8 * 128 * 4,
    )

    partial_slab = pl.pallas_call(
        kernel,
        out_shape=jax.ShapeDtypeStruct((num_tiles * 8, 128), jnp.float32),
        grid=(num_tiles,),
        in_specs=[
            pl.BlockSpec((tile_n, c), lambda i: (i, 0)),   # logits row tile (native dtype)
            pl.BlockSpec((tile_n, 1), lambda i: (i, 0)),   # targets row tile
            pl.BlockSpec((1, c), lambda i: (0, 0)),        # class weights (same block each step)
        ],
        out_specs=pl.BlockSpec((8, 128), lambda i: (i, 0)),
        compiler_params=pltpu.CompilerParams(
            dimension_semantics=("parallel",),
            vmem_limit_bytes=32 * 1024 * 1024,
        ),
        cost_estimate=cost,
    )(logits, targets_2d, weights_2d)

    partials = partial_slab.reshape(num_tiles, 8, 128)[:, 0, 0]
    return jnp.sum(partials) / jnp.float32(n)


class FedAlignLoss:
    """JAX/Pallas port of the PyTorch FedAlignLoss module (same forward semantics)."""

    def __init__(self, label_counts, num_classes, epsilon=1e-06):
        self.label_counts = label_counts
        self.num_classes = num_classes
        self.epsilon = epsilon
        w = [1.0] * num_classes
        for label, count in label_counts.items():
            if 0 <= label < num_classes:
                w[label] = 1.0 / (count + epsilon)
        w = jnp.asarray(w, dtype=jnp.float32)
        if float(jnp.sum(w)) > 0:
            w = w / jnp.sum(w) * num_classes
        self.weights = w

    def forward(self, outputs, targets):
        outputs = jnp.asarray(outputs)
        targets = jnp.asarray(targets)

        # Flatten (batch, seq, classes) -> (batch*seq, classes), repeat targets per seq position.
        if outputs.ndim > 2 and targets.ndim == 1:
            batch_size = outputs.shape[0]
            seq_len = outputs.shape[1]
            num_classes = outputs.shape[2]
            outputs = outputs.reshape(-1, num_classes)
            if targets.shape[0] == batch_size:
                targets = jnp.repeat(targets, seq_len)

        if outputs.shape[0] != targets.shape[0]:
            # Mismatch fallback: standard (unweighted) mean cross-entropy using the same kernel.
            print(f"Warning: FedAlignLoss - batch size mismatch: outputs {outputs.shape[0]}, "
                  f"targets {targets.shape[0]}. Using standard loss.")
            ones = jnp.ones((outputs.shape[1],), dtype=jnp.float32)
            return _fedalign_loss_call(outputs, targets, ones)

        return _fedalign_loss_call(outputs, targets, self.weights)

    __call__ = forward


def _reference_loss(outputs, targets, weights):
    """Pure-JAX reference mirroring torch CrossEntropyLoss(weight, 'none').mean()."""
    logp = jax.nn.log_softmax(outputs.astype(jnp.float32), axis=-1)
    logp_t = jnp.take_along_axis(logp, targets[:, None], axis=-1)[:, 0]
    w_t = weights[targets]
    return jnp.mean(-w_t * logp_t)


if __name__ == "__main__":
    key = jax.random.PRNGKey(0)
    k1, k2, k3, k4 = jax.random.split(key, 4)

    num_classes = 16
    label_counts = {c: (c + 1) * 3 for c in range(num_classes)}
    loss_mod = FedAlignLoss(label_counts, num_classes)

    # --- Path 1: module forward on 3-D logits (batch, seq, classes) with per-batch targets ---
    batch, seq = 2, 8
    outputs = jax.random.normal(k1, (batch, seq, num_classes), dtype=jnp.float32)
    targets = jax.random.randint(k2, (batch,), 0, num_classes, dtype=jnp.int32)

    loss = jax.block_until_ready(loss_mod(outputs, targets))
    flat_out = outputs.reshape(-1, num_classes)
    flat_tgt = jnp.repeat(targets, seq)
    ref = _reference_loss(flat_out, flat_tgt, loss_mod.weights)
    assert jnp.allclose(loss, ref, rtol=1e-5, atol=1e-5), (loss, ref)

    # --- Path 2: tiled path with a ragged tail (N % TILE_N != 0) and native bf16 logits ---
    n2, c2 = 21, num_classes
    logits2 = jax.random.normal(k3, (n2, c2), dtype=jnp.float32).astype(jnp.bfloat16)
    targets2 = jax.random.randint(k4, (n2,), 0, c2, dtype=jnp.int32)
    loss2 = jax.block_until_ready(
        _fedalign_loss_call(logits2, targets2, loss_mod.weights, tile_n=8))
    ref2 = _reference_loss(logits2.astype(jnp.float32), targets2, loss_mod.weights)
    assert jnp.allclose(loss2, ref2, rtol=1e-5, atol=1e-5), (loss2, ref2)

    print("KERNEL_OK")
</pallas_src>

<mosaic_0001>
module attributes {stable_mosaic.version = 11 : i64} {
  func.func @_fedalign_tile_kernel(%arg0: i32, %arg1: memref<16x16xf32, #tpu.memory_space<vmem>>, %arg2: memref<16x1xi32, #tpu.memory_space<vmem>>, %arg3: memref<1x16xf32, #tpu.memory_space<vmem>>, %arg4: memref<8x128xf32, #tpu.memory_space<vmem>>) attributes {dimension_semantics = [#tpu.dimension_semantics<parallel>], iteration_bounds = array<i64: 1>, scalar_prefetch = 0 : i64, scratch_operands = 0 : i64, tpu.core_type = #tpu.core_type<tc>, window_params = [{transform_indices = @transform_0, window_bounds = array<i64: 16, 16>}, {transform_indices = @transform_1, window_bounds = array<i64: 16, 1>}, {pipeline_mode = #tpu.pipeline_mode<synchronous>, transform_indices = @transform_2, window_bounds = array<i64: 1, 16>}, {transform_indices = @transform_3, window_bounds = array<i64: 8, 128>}]} {
    %c0 = arith.constant 0 : index
    %c0_0 = arith.constant 0 : index
    %0 = vector.load %arg1[%c0, %c0_0] : memref<16x16xf32, #tpu.memory_space<vmem>>, vector<16x16xf32>
    %c0_1 = arith.constant 0 : index
    %c0_2 = arith.constant 0 : index
    %1 = vector.load %arg2[%c0_1, %c0_2] : memref<16x1xi32, #tpu.memory_space<vmem>>, vector<16x1xi32>
    %c0_3 = arith.constant 0 : index
    %c0_4 = arith.constant 0 : index
    %2 = vector.load %arg3[%c0_3, %c0_4] : memref<1x16xf32, #tpu.memory_space<vmem>>, vector<1x16xf32>
    %cst = arith.constant dense<0xFF800000> : vector<16xf32>
    %3 = vector.multi_reduction <maximumf>, %0, %cst [1] : vector<16x16xf32> to vector<16xf32>
    %4 = vector.shape_cast %3 : vector<16xf32> to vector<16x1xf32>
    %5 = vector.broadcast %4 : vector<16x1xf32> to vector<16x16xf32>
    %6 = arith.subf %0, %5 : vector<16x16xf32>
    %7 = math.exp %6 : vector<16x16xf32>
    %cst_5 = arith.constant dense<0.000000e+00> : vector<16xf32>
    %8 = vector.multi_reduction <add>, %7, %cst_5 [1] : vector<16x16xf32> to vector<16xf32>
    %9 = vector.shape_cast %8 : vector<16xf32> to vector<16x1xf32>
    %10 = math.log %9 : vector<16x1xf32>
    %11 = vector.broadcast %10 : vector<16x1xf32> to vector<16x16xf32>
    %12 = arith.subf %6, %11 : vector<16x16xf32>
    %13 = tpu.iota {dimensions = array<i32: 1>} : vector<16x16xi32>
    %14 = vector.broadcast %1 : vector<16x1xi32> to vector<16x16xi32>
    %15 = arith.cmpi eq, %13, %14 : vector<16x16xi32>
    %cst_6 = arith.constant 0.000000e+00 : f32
    %16 = vector.shape_cast %2 : vector<1x16xf32> to vector<1x16xf32>
    %17 = vector.broadcast %16 : vector<1x16xf32> to vector<16x16xf32>
    %18 = vector.broadcast %cst_6 : f32 to vector<16x16xf32>
    %19 = arith.select %15, %17, %18 : vector<16x16xi1>, vector<16x16xf32>
    %20 = arith.mulf %19, %12 : vector<16x16xf32>
    %cst_7 = arith.constant dense<0.000000e+00> : vector<16xf32>
    %21 = vector.multi_reduction <add>, %20, %cst_7 [1] : vector<16x16xf32> to vector<16xf32>
    %22 = vector.shape_cast %21 : vector<16xf32> to vector<16x1xf32>
    %cst_8 = arith.constant 0.000000e+00 : f32
    %23 = vector.broadcast %cst_8 : f32 to vector<16x1xf32>
    %24 = arith.subf %23, %22 : vector<16x1xf32>
    %25 = tpu.iota {dimensions = array<i32: 0>} : vector<16x1xi32>
    %c16_i32 = arith.constant 16 : i32
    %26 = arith.muli %arg0, %c16_i32 : i32
    %27 = vector.broadcast %26 : i32 to vector<16x1xi32>
    %28 = arith.addi %27, %25 : vector<16x1xi32>
    %c16_i32_9 = arith.constant 16 : i32
    %29 = vector.broadcast %c16_i32_9 : i32 to vector<16x1xi32>
    %30 = arith.cmpi slt, %28, %29 : vector<16x1xi32>
    %cst_10 = arith.constant 0.000000e+00 : f32
    %31 = vector.broadcast %cst_10 : f32 to vector<16x1xf32>
    %32 = arith.select %30, %24, %31 : vector<16x1xi1>, vector<16x1xf32>
    %33 = vector.shape_cast %32 : vector<16x1xf32> to vector<1x16x1xf32>
    %cst_11 = arith.constant dense<0.000000e+00> : vector<1xf32>
    %34 = vector.multi_reduction <add>, %33, %cst_11 [1, 2] : vector<1x16x1xf32> to vector<1xf32>
    %35 = vector.shape_cast %34 : vector<1xf32> to vector<1x1x1xf32>
    %36 = vector.extract %35[0, 0, 0] : f32 from vector<1x1x1xf32>
    %37 = vector.broadcast %36 : f32 to vector<1x1xf32>
    %38 = vector.shape_cast %37 : vector<1x1xf32> to vector<1x1xf32>
    %39 = vector.broadcast %38 : vector<1x1xf32> to vector<8x128xf32>
    %c0_12 = arith.constant 0 : index
    %c0_13 = arith.constant 0 : index
    %40 = vector.load %arg4[%c0_12, %c0_13] : memref<8x128xf32, #tpu.memory_space<vmem>>, vector<8x128xf32>
    tpu.vector_store %arg4[%c0_12, %c0_13], %39 {strides = array<i32>} : memref<8x128xf32, #tpu.memory_space<vmem>>, vector<8x128xf32>,
    return
  }
  func.func @transform_0(%arg0: i32) -> (i32, i32) {
    %c0_i32 = arith.constant 0 : i32
    %c0_i32_0 = arith.constant 0 : i32
    return %arg0, %c0_i32 : i32, i32
  }
  func.func @transform_1(%arg0: i32) -> (i32, i32) {
    %c0_i32 = arith.constant 0 : i32
    %c0_i32_0 = arith.constant 0 : i32
    return %arg0, %c0_i32 : i32, i32
  }
  func.func @transform_2(%arg0: i32) -> (i32, i32) {
    %c0_i32 = arith.constant 0 : i32
    %c0_i32_0 = arith.constant 0 : i32
    %c0_i32_1 = arith.constant 0 : i32
    return %c0_i32, %c0_i32_0 : i32, i32
  }
  func.func @transform_3(%arg0: i32) -> (i32, i32) {
    %c0_i32 = arith.constant 0 : i32
    %c0_i32_0 = arith.constant 0 : i32
    return %arg0, %c0_i32 : i32, i32
  }
}

</mosaic_0001>

<bundles_post_ra>
// kernel: tpu_custom_call.1
= control target key start
LH: loop header
LB: loop body
LE: loop exit
PB: predicated region body
PF: predicated region fallthrough
CT: control target
= control target key end

     0   :  { %vm20_vm0 = vcmask 130048   ;;  %s199_s0 = inlined_call_operand.vmem [shape: f32[16,16], index: 0, kind: input, shape index: {}]   ;;  %s200_s1 = inlined_call_operand.vmem [shape: s32[16,1], index: 1, kind: input, shape index: {}]   ;;  %s201_s2 = inlined_call_operand.vmem [shape: f32[1,16], index: 2, kind: input, shape index: {}]   ;;  %s202_s3 = inlined_call_operand.hbm [shape: f32[8,128], index: 3, kind: output, shape index: {}]  }
   0x1   :  { %v15_v0 = vld [vmem:[%s199_s0] sm:$0xff] }
   0x2   :  { %v21_v1 = vsel %vm20_vm0, %v15_v0, -inf }
   0x3   :  { %8 = vsyncpa [#allocation3], 0  ;;  %22 = vmax.xlane.f32.xlu0 %v21_v1  ;;  %v16_v2 = vld [vmem:[%s199_s0 + $0x8] sm:$0xff]  ;;  %v17_v4 = vld [vmem:[%s200_s1] sm:$0xff]  ;;  %v153_v5 = vmov 0   ;;  %v45_v17 = vlaneseq  ;;  %vm81_vm3 = vcmask 7168  }
   0x4   :  { %v24_v3 = vsel %vm20_vm0, %v16_v2, -inf  ;;  %116 = vset.pattern.permute.xlu2 %v153_v5  ;;  %117 = vset.pattern.permute.xlu0 %v153_v5  ;;  %v18_v6 = vld [vmem:[%s200_s1 + $0x8] sm:$0xff]  ;;  %v118_v21 = vld [vmem:[%s201_s2] ss:$0 sm:$0xff]  ;;  %s154_s2 = smov [#allocation2]   ;;  %s103_s23 = sshll.u32 %s202_s3, 4  ;;  %s104_s23 = int_to_ptr.hbm [resolvable:$true] %s103_s23 }
   0x5   :  { %48 = vperm.xlu2 %116, %v17_v4   ;;  %v46_v19 = vand.u32 127, %v45_v17  ;;  %s101_s20 = sshll.u32 %s154_s2, 4  ;;  %s102_s20 = int_to_ptr.vmem [resolvable:$true] %s101_s20 }
   0xb   :  { %25 = vmax.xlane.f32.xlu0 %v24_v3 }
   0xd   :  { %51 = vperm.xlu2 %116, %v18_v6  }
  0x5f   :  { %v49_v20 = vpop.permute.xlu2 %48 }
  0x60   :  { %vm53_vm1 = vcmp.eq.s32.totalorder %v46_v19, %v49_v20 }
  0x61   :  { %v58_v25 = vsel %vm53_vm1, %v118_v21, 0.0 }
  0x67   :  { %v52_v28 = vpop.permute.xlu2 %51 }
  0x68   :  { %vm54_vm2 = vcmp.eq.s32.totalorder %v46_v19, %v52_v28 }
  0x69   :  { %v59_v33 = vsel %vm54_vm2, %v118_v21, 0.0 }
  0x76   :  { %v23_v7 = vpop.xlane.xlu0 %22 }
  0x77   :  { %v27_v8 = vsub.f32 %v15_v0, %v23_v7 }
  0x79   :  { %v29_v9 = vmul.f32 1.442695, %v27_v8 }
  0x7b   :  { %119 = vpow2.f32 %v29_v9 }
  0x7e   :  { %v26_v10 = vpop.xlane.xlu0 %25 }
  0x7f   :  { %v28_v11 = vsub.f32 %v16_v2, %v26_v10 }
  0x81   :  { %v120_v12 = vpop.eup %119  ;;  %v31_v13 = vmul.f32 1.442695, %v28_v11 }
  0x82   :  { %v33_v14 = vsel %vm20_vm0, %v120_v12, 0.0 }
  0x83   :  { %121 = vpow2.f32 %v31_v13  ;;  %34 = vadd.xlane.f32.xlu1 %v33_v14 }
  0x89   :  { %v122_v15 = vpop.eup %121 }
  0x8a   :  { %v36_v16 = vsel %vm20_vm0, %v122_v15, 0.0 }
  0x8b   :  { %37 = vadd.xlane.f32.xlu1 %v36_v16 }
  0xf6   :  { %v35_v18 = vpop.xlane.xlu1 %34 }
  0xf7   :  { %123 = vlog2.f32 %v35_v18 }
  0xfd   :  { %v124_v22 = vpop.eup %123 }
  0xfe   :  { %v40_v23 = vmul.f32 0.6931472, %v124_v22  ;;  %v38_v24 = vpop.xlane.xlu1 %37 }
  0xff   :  { %125 = vlog2.f32 %v38_v24 }
 0x100   :  { %v43_v26 = vsub.f32 %v27_v8, %v40_v23 }
 0x102   :  { %v60_v27 = vmul.f32 %v58_v25, %v43_v26 }
 0x104   :  { %v62_v29 = vsel %vm20_vm0, %v60_v27, 0.0 }
 0x105   :  { %v126_v30 = vpop.eup %125  ;;  %63 = vadd.xlane.f32.xlu0 %v62_v29 }
 0x106   :  { %v42_v31 = vmul.f32 0.6931472, %v126_v30 }
 0x108   :  { %v44_v32 = vsub.f32 %v28_v11, %v42_v31 }
 0x10a   :  { %v61_v34 = vmul.f32 %v59_v33, %v44_v32 }
 0x10c   :  { %v65_v35 = vsel %vm20_vm0, %v61_v34, 0.0 }
 0x10d   :  { %66 = vadd.xlane.f32.xlu1 %v65_v35 }
 0x178   :  { %v64_v36 = vpop.xlane.xlu0 %63 }
 0x179   :  { %v68_v37 = vsub.f32 0.0, %v64_v36 }
 0x17b   :  { %v82_v40 = vsel %vm81_vm3, %v68_v37, 0.0 }
 0x180   :  { %v67_v38 = vpop.xlane.xlu1 %66 }
 0x181   :  { %v69_v39 = vsub.f32 0.0, %v67_v38 }
 0x183   :  { %v83_v41 = vsel %vm81_vm3, %v69_v39, 0.0 }
 0x184   :  { %v84_v42 = vadd.f32 %v83_v41, %v82_v40 }
 0x186   :  { %85 = vadd.xlane.f32.xlu2 %v84_v42 }
 0x1f9   :  { %v86_v43 = vpop.xlane.xlu2 %85 }
 0x1fa   :  { %v87_v44 = vrot.slane %v86_v43, 4 }
 0x1fc   :  { %v88_v45 = vadd.f32 %v87_v44, %v86_v43 }
 0x1fe   :  { %v89_v46 = vrot.slane %v88_v45, 2 }
 0x200   :  { %v90_v47 = vadd.f32 %v89_v46, %v88_v45 }
 0x202   :  { %v91_v48 = vrot.slane %v90_v47, 1 }
 0x204   :  { %v92_v49 = vadd.f32 %v91_v48, %v90_v47 }
 0x206   :  { %112 = vpush %v92_v49 }
 0x237   :  { %s113_s24 = spop %112 }
 0x238   :  { %v94_v50 = vstv %s113_s24 }
 0x239   :  { %95 = vst [vmem:[#allocation2] sm:$0xff] %v94_v50 }
 0x23a   :  { %106 = dma.vmem_to_hbm [thread:$0]  %s102_s20, 128, %s104_s23, [#allocation3]  }
 0x23b   :  { %151 = dma.done.wait [#allocation3], 128  }
 0x23c   :  { %152 = vsyncadd [#allocation3], 4294967168 }
 0x23d   :  { %111 = vsyncpa [#allocation3], 1 }

</bundles_post_ra>
